<compile_context>
chip_gen: v7x
topology: tpu7x:2x2x1
jax: 0.10.0
libtpu: 0.0.40
codegen_flags: <defaults>
</compile_context>

<pallas_src>
from functools import partial

import jax
import jax.numpy as jnp
from jax import lax
from jax.experimental import pallas as pl
from jax.experimental.pallas import tpu as pltpu

_EPS = 1e-5
_VMEM_FALLBACK = 48 * 1024 * 1024  # safe on v5e / v6e / v7x if hw query fails


def _vmem_budget():
    """VMEM limit to request, derived from the chip when possible."""
    try:
        cap = pltpu.get_tpu_info().vmem_capacity_bytes
        return max(32 * 1024 * 1024, min(cap - 16 * 1024 * 1024, 96 * 1024 * 1024))
    except Exception:
        return _VMEM_FALLBACK


def _divisor_row_tile(r, max_rows):
    """Largest row tile <= max_rows that is a multiple of 8 and divides r,
    else r itself (full extent is always a legal sublane block size)."""
    if r <= max_rows:
        return r
    d = (min(max_rows, r) // 8) * 8
    while d >= 8:
        if r % d == 0:
            return d
        d -= 8
    # No multiple-of-8 divisor (only possible when r % 8 != 0): fall back to
    # full extent.  Rare for real conv shapes (N*C is normally a multiple of 8).
    return r


def _stats_row_tile(r, l, itemsize, budget):
    # Pass 1: double-buffered input block + two small (rows, 128) f32 outputs.
    per_row = 2 * l * itemsize + 4 * 128 * 4
    max_rows = max(8, (budget // 2) // max(per_row, 1))
    max_rows = min(max_rows, max(8, (4 * 1024 * 1024) // max(l, 1)))  # <=4M elem
    return _divisor_row_tile(r, max_rows)


def _apply_row_tile(r, l, itemsize, budget):
    # Pass 2: double-buffered input AND output blocks + tiny scale/shift blocks.
    per_row = 4 * l * itemsize + 4 * 4
    max_rows = max(8, (budget // 2) // max(per_row, 1))
    max_rows = min(max_rows, max(8, (1024 * 1024) // max(l, 1)))      # <=1M elem
    return _divisor_row_tile(r, max_rows)


# --------------------------------------------------------------------------
# Kernels
# --------------------------------------------------------------------------
def _bn_fused_kernel(x_ref, g_ref, b_ref, o_ref):
    """Whole-tensor BN: stats + affine in one pass (x resident in VMEM).

    x_ref: (N, C, L)   g_ref/b_ref: (1, C, 1) f32   o_ref: (N, C, L)
    """
    x = x_ref[...].astype(jnp.float32)
    count = jnp.float32(x.shape[0] * x.shape[2])
    s = jnp.sum(jnp.sum(x, axis=2, keepdims=True), axis=0, keepdims=True)
    mean = s / count
    d = x - mean
    var = jnp.sum(jnp.sum(d * d, axis=2, keepdims=True), axis=0, keepdims=True) / count
    inv_std = lax.rsqrt(var + _EPS)
    o_ref[...] = (d * (inv_std * g_ref[...]) + b_ref[...]).astype(o_ref.dtype)


def _bn_stats_kernel(x_ref, sum_ref, sq_ref):
    """Per-row sum and sum-of-squares into lane-dense (rows, 128) accumulators.

    x_ref:   (rows, L)   current row block (full spatial extent per row)
    sum_ref: (rows, 128) f32
    sq_ref:  (rows, 128) f32
    Lane chunks of 128 are accumulated with plain vreg adds (VALU only); the
    final 128-lane reduce happens in the JAX finalize.
    """
    rows, l = x_ref.shape
    n_full = l // 128
    rem = l - n_full * 128

    sum_ref[...] = jnp.zeros_like(sum_ref)
    sq_ref[...] = jnp.zeros_like(sq_ref)

    def body(k, carry):
        off = pl.multiple_of(k * 128, 128)
        chunk = x_ref[:, pl.ds(off, 128)].astype(jnp.float32)
        sum_ref[...] += chunk
        sq_ref[...] += chunk * chunk
        return carry

    if n_full > 0:
        lax.fori_loop(0, n_full, body, 0)

    if rem > 0:
        tail = x_ref[:, pl.ds(n_full * 128, rem)].astype(jnp.float32)
        sum_ref[:, :rem] += tail
        sq_ref[:, :rem] += tail * tail


def _bn_apply_kernel(x_ref, scale_ref, shift_ref, o_ref):
    """out = x * scale + shift with per-row folded scale/shift.

    x_ref/o_ref: (rows, L)   scale_ref/shift_ref: (rows, 1) f32
    """
    x = x_ref[...].astype(jnp.float32)
    o_ref[...] = (x * scale_ref[...] + shift_ref[...]).astype(o_ref.dtype)


# --------------------------------------------------------------------------
# Wrappers
# --------------------------------------------------------------------------
def _bn_fused(x_nchw, gamma, beta, budget):
    n, c, h, w = x_nchw.shape
    l = h * w
    x3 = x_nchw.reshape(n, c, l)
    g3 = gamma.astype(jnp.float32).reshape(1, c, 1)
    b3 = beta.astype(jnp.float32).reshape(1, c, 1)
    full = lambda i: (0, 0, 0)
    out3 = pl.pallas_call(
        _bn_fused_kernel,
        out_shape=jax.ShapeDtypeStruct((n, c, l), x_nchw.dtype),
        grid=(1,),
        in_specs=[pl.BlockSpec((n, c, l), full),
                  pl.BlockSpec((1, c, 1), full),
                  pl.BlockSpec((1, c, 1), full)],
        out_specs=pl.BlockSpec((n, c, l), full),
        compiler_params=pltpu.CompilerParams(
            dimension_semantics=("arbitrary",),
            vmem_limit_bytes=budget),
    )(x3, g3, b3)
    return out3.reshape(n, c, h, w)


def _bn_two_pass(x_nchw, gamma, beta, budget):
    n, c, h, w = x_nchw.shape
    l = h * w
    r = n * c
    itemsize = x_nchw.dtype.itemsize
    x2 = x_nchw.reshape(r, l)                       # free: NCHW is row-contiguous

    # ---- pass 1: per-row partial stats -------------------------------------
    rows_s = _stats_row_tile(r, l, itemsize, budget)
    sums, sqs = pl.pallas_call(
        _bn_stats_kernel,
        out_shape=(jax.ShapeDtypeStruct((r, 128), jnp.float32),
                   jax.ShapeDtypeStruct((r, 128), jnp.float32)),
        grid=(r // rows_s,),
        in_specs=[pl.BlockSpec((rows_s, l), lambda i: (i, 0))],
        out_specs=(pl.BlockSpec((rows_s, 128), lambda i: (i, 0)),
                   pl.BlockSpec((rows_s, 128), lambda i: (i, 0))),
        compiler_params=pltpu.CompilerParams(
            dimension_semantics=("parallel",),
            vmem_limit_bytes=budget),
    )(x2)

    # ---- tiny O(N*C*128) finalize + affine fold in plain JAX ---------------
    count = jnp.float32(n * l)
    s_c = jnp.sum(sums, axis=1).reshape(n, c).sum(axis=0)        # (C,)
    q_c = jnp.sum(sqs, axis=1).reshape(n, c).sum(axis=0)         # (C,)
    mean = s_c / count
    # NOTE: E[x^2] - mean^2 in f32 with a clamp; adequate for BN activations,
    # slightly less robust than the fused path's mean-subtracted variance.
    var = jnp.maximum(q_c / count - mean * mean, 0.0)
    inv_std = lax.rsqrt(var + _EPS)
    scale = gamma.astype(jnp.float32) * inv_std                  # (C,)
    shift = beta.astype(jnp.float32) - mean * scale              # (C,)
    scale_r = jnp.tile(scale, n).reshape(r, 1)                   # row n*C + c -> channel c
    shift_r = jnp.tile(shift, n).reshape(r, 1)

    # ---- pass 2: elementwise normalize --------------------------------------
    rows_a = _apply_row_tile(r, l, itemsize, budget)
    out2 = pl.pallas_call(
        _bn_apply_kernel,
        out_shape=jax.ShapeDtypeStruct((r, l), x_nchw.dtype),
        grid=(r // rows_a,),
        in_specs=[pl.BlockSpec((rows_a, l), lambda i: (i, 0)),
                  pl.BlockSpec((rows_a, 1), lambda i: (i, 0)),
                  pl.BlockSpec((rows_a, 1), lambda i: (i, 0))],
        out_specs=pl.BlockSpec((rows_a, l), lambda i: (i, 0)),
        compiler_params=pltpu.CompilerParams(
            dimension_semantics=("parallel",),
            vmem_limit_bytes=budget),
    )(x2, scale_r, shift_r)
    return out2.reshape(n, c, h, w)


@partial(jax.jit, static_argnames=("force_tiled",))
def batch_norm_2d_pallas(x_nchw, gamma, beta, force_tiled=False):
    """Training-mode BatchNorm2d forward on an NCHW input using Pallas kernels."""
    n, c, h, w = x_nchw.shape
    l = h * w
    budget = _vmem_budget()
    fused_limit_bytes = min(budget // 10, 4 * 1024 * 1024)      # f32 working size
    if (not force_tiled) and n * c * l * 4 <= fused_limit_bytes:
        return _bn_fused(x_nchw, gamma, beta, budget)
    return _bn_two_pass(x_nchw, gamma, beta, budget)


# --------------------------------------------------------------------------
# Module
# --------------------------------------------------------------------------
class SwitchableBatchNorm2d:
    """JAX/Pallas port of the slimmable SwitchableBatchNorm2d (forward only).

    Parameters are created deterministically in-script (no .json / .pt loads).
    """

    def __init__(self, num_features_list, width_mult_list, key):
        self.num_features_list = list(num_features_list)
        self.num_features = max(num_features_list)
        self.width_mult_list = list(width_mult_list)
        self.width_mult = max(width_mult_list)
        self.ignore_model_profiling = True
        # One (gamma, beta) pair per BN.  torch default init is gamma=1,
        # beta=0; perturb deterministically so the affine path is exercised.
        self.bn_params = []
        for nf in self.num_features_list:
            kg, kb, key = jax.random.split(key, 3)
            gamma = 1.0 + 0.1 * jax.random.normal(kg, (nf,), dtype=jnp.float32)
            beta = 0.1 * jax.random.normal(kb, (nf,), dtype=jnp.float32)
            self.bn_params.append((gamma, beta))

    def __call__(self, x_nchw):
        idx = self.width_mult_list.index(self.width_mult)
        expected_features = self.num_features_list[idx]
        input_num_channels = x_nchw.shape[1]
        if input_num_channels != expected_features:
            raise ValueError(
                f'Expected {expected_features} input channels, '
                f'got {input_num_channels}')
        gamma, beta = self.bn_params[idx]
        return batch_norm_2d_pallas(x_nchw, gamma, beta)


def _reference_bn(x_nchw, gamma, beta):
    x = x_nchw.astype(jnp.float32)
    mean = jnp.mean(x, axis=(0, 2, 3), keepdims=True)
    var = jnp.mean((x - mean) ** 2, axis=(0, 2, 3), keepdims=True)
    g = gamma.reshape(1, -1, 1, 1)
    b = beta.reshape(1, -1, 1, 1)
    return ((x - mean) * lax.rsqrt(var + _EPS) * g + b).astype(x_nchw.dtype)


if __name__ == "__main__":
    key = jax.random.PRNGKey(0)
    k_x, k_params = jax.random.split(key)

    # Switchable widths: width_mult_list = [0.5, 1.0], features [2, 4].
    # forward() selects max width -> 4 channels.
    num_features_list = [2, 4]
    width_mult_list = [0.5, 1.0]
    module = SwitchableBatchNorm2d(num_features_list, width_mult_list, k_params)

    # NCHW input matching the selected (max-width) BN: (N=2, C=4, H=16, W=16).
    x = jax.random.normal(k_x, (2, 4, 16, 16), dtype=jnp.float32)

    gamma, beta = module.bn_params[1]
    ref = _reference_bn(x, gamma, beta)

    # Default dispatch (small tensor -> fused single-pass kernel).
    out = jax.block_until_ready(module(x))
    assert out.shape == x.shape and out.dtype == x.dtype
    assert float(jnp.max(jnp.abs(out - ref))) < 1e-4

    # Also exercise the tiled two-pass path at the same small shape.
    out_tiled = jax.block_until_ready(
        batch_norm_2d_pallas(x, gamma, beta, force_tiled=True))
    assert out_tiled.shape == x.shape and out_tiled.dtype == x.dtype
    assert float(jnp.max(jnp.abs(out_tiled - ref))) < 1e-4

    print("KERNEL_OK")
</pallas_src>

<mosaic_0001>
module attributes {stable_mosaic.version = 11 : i64} {
  func.func @_bn_fused_kernel(%arg0: i32, %arg1: memref<2x4x256xf32, #tpu.memory_space<vmem>>, %arg2: memref<1x4x1xf32, #tpu.memory_space<vmem>>, %arg3: memref<1x4x1xf32, #tpu.memory_space<vmem>>, %arg4: memref<2x4x256xf32, #tpu.memory_space<vmem>>) attributes {dimension_semantics = [#tpu.dimension_semantics<arbitrary>], iteration_bounds = array<i64: 1>, scalar_prefetch = 0 : i64, scratch_operands = 0 : i64, tpu.core_type = #tpu.core_type<tc>, window_params = [{pipeline_mode = #tpu.pipeline_mode<synchronous>, transform_indices = @transform_0, window_bounds = array<i64: 2, 4, 256>}, {pipeline_mode = #tpu.pipeline_mode<synchronous>, transform_indices = @transform_1, window_bounds = array<i64: 1, 4, 1>}, {pipeline_mode = #tpu.pipeline_mode<synchronous>, transform_indices = @transform_2, window_bounds = array<i64: 1, 4, 1>}, {pipeline_mode = #tpu.pipeline_mode<synchronous>, transform_indices = @transform_3, window_bounds = array<i64: 2, 4, 256>}]} {
    %c0 = arith.constant 0 : index
    %c0_0 = arith.constant 0 : index
    %c0_1 = arith.constant 0 : index
    %0 = vector.load %arg1[%c0, %c0_0, %c0_1] : memref<2x4x256xf32, #tpu.memory_space<vmem>>, vector<2x4x256xf32>
    %cst = arith.constant dense<0.000000e+00> : vector<2x4xf32>
    %1 = vector.multi_reduction <add>, %0, %cst [2] : vector<2x4x256xf32> to vector<2x4xf32>
    %2 = vector.shape_cast %1 : vector<2x4xf32> to vector<2x4x1xf32>
    %cst_2 = arith.constant dense<0.000000e+00> : vector<4x1xf32>
    %3 = vector.multi_reduction <add>, %2, %cst_2 [0] : vector<2x4x1xf32> to vector<4x1xf32>
    %4 = vector.shape_cast %3 : vector<4x1xf32> to vector<1x4x1xf32>
    %cst_3 = arith.constant 5.120000e+02 : f32
    %5 = vector.broadcast %cst_3 : f32 to vector<1x4x1xf32>
    %6 = arith.divf %4, %5 : vector<1x4x1xf32>
    %7 = vector.broadcast %6 : vector<1x4x1xf32> to vector<2x4x256xf32>
    %8 = arith.subf %0, %7 : vector<2x4x256xf32>
    %9 = arith.mulf %8, %8 : vector<2x4x256xf32>
    %cst_4 = arith.constant dense<0.000000e+00> : vector<2x4xf32>
    %10 = vector.multi_reduction <add>, %9, %cst_4 [2] : vector<2x4x256xf32> to vector<2x4xf32>
    %11 = vector.shape_cast %10 : vector<2x4xf32> to vector<2x4x1xf32>
    %cst_5 = arith.constant dense<0.000000e+00> : vector<4x1xf32>
    %12 = vector.multi_reduction <add>, %11, %cst_5 [0] : vector<2x4x1xf32> to vector<4x1xf32>
    %13 = vector.shape_cast %12 : vector<4x1xf32> to vector<1x4x1xf32>
    %cst_6 = arith.constant 5.120000e+02 : f32
    %14 = vector.broadcast %cst_6 : f32 to vector<1x4x1xf32>
    %15 = arith.divf %13, %14 : vector<1x4x1xf32>
    %cst_7 = arith.constant 9.99999974E-6 : f32
    %16 = vector.broadcast %cst_7 : f32 to vector<1x4x1xf32>
    %17 = arith.addf %15, %16 : vector<1x4x1xf32>
    %18 = math.rsqrt %17 : vector<1x4x1xf32>
    %c0_8 = arith.constant 0 : index
    %c0_9 = arith.constant 0 : index
    %c0_10 = arith.constant 0 : index
    %19 = vector.load %arg2[%c0_8, %c0_9, %c0_10] : memref<1x4x1xf32, #tpu.memory_space<vmem>>, vector<1x4x1xf32>
    %20 = arith.mulf %18, %19 : vector<1x4x1xf32>
    %21 = vector.broadcast %20 : vector<1x4x1xf32> to vector<2x4x256xf32>
    %22 = arith.mulf %8, %21 : vector<2x4x256xf32>
    %c0_11 = arith.constant 0 : index
    %c0_12 = arith.constant 0 : index
    %c0_13 = arith.constant 0 : index
    %23 = vector.load %arg3[%c0_11, %c0_12, %c0_13] : memref<1x4x1xf32, #tpu.memory_space<vmem>>, vector<1x4x1xf32>
    %24 = vector.broadcast %23 : vector<1x4x1xf32> to vector<2x4x256xf32>
    %25 = arith.addf %22, %24 : vector<2x4x256xf32>
    %c0_14 = arith.constant 0 : index
    %c0_15 = arith.constant 0 : index
    %c0_16 = arith.constant 0 : index
    %26 = vector.load %arg4[%c0_14, %c0_15, %c0_16] : memref<2x4x256xf32, #tpu.memory_space<vmem>>, vector<2x4x256xf32>
    tpu.vector_store %arg4[%c0_14, %c0_15, %c0_16], %25 {strides = array<i32>} : memref<2x4x256xf32, #tpu.memory_space<vmem>>, vector<2x4x256xf32>,
    return
  }
  func.func @transform_0(%arg0: i32) -> (i32, i32, i32) {
    %c0_i32 = arith.constant 0 : i32
    %c0_i32_0 = arith.constant 0 : i32
    %c0_i32_1 = arith.constant 0 : i32
    %c0_i32_2 = arith.constant 0 : i32
    return %c0_i32, %c0_i32_0, %c0_i32_1 : i32, i32, i32
  }
  func.func @transform_1(%arg0: i32) -> (i32, i32, i32) {
    %c0_i32 = arith.constant 0 : i32
    %c0_i32_0 = arith.constant 0 : i32
    %c0_i32_1 = arith.constant 0 : i32
    %c0_i32_2 = arith.constant 0 : i32
    return %c0_i32, %c0_i32_0, %c0_i32_1 : i32, i32, i32
  }
  func.func @transform_2(%arg0: i32) -> (i32, i32, i32) {
    %c0_i32 = arith.constant 0 : i32
    %c0_i32_0 = arith.constant 0 : i32
    %c0_i32_1 = arith.constant 0 : i32
    %c0_i32_2 = arith.constant 0 : i32
    return %c0_i32, %c0_i32_0, %c0_i32_1 : i32, i32, i32
  }
  func.func @transform_3(%arg0: i32) -> (i32, i32, i32) {
    %c0_i32 = arith.constant 0 : i32
    %c0_i32_0 = arith.constant 0 : i32
    %c0_i32_1 = arith.constant 0 : i32
    %c0_i32_2 = arith.constant 0 : i32
    return %c0_i32, %c0_i32_0, %c0_i32_1 : i32, i32, i32
  }
}

</mosaic_0001>

<bundles_post_ra>
// kernel: batch_norm_2d_pallas.1
= control target key start
LH: loop header
LB: loop body
LE: loop exit
PB: predicated region body
PF: predicated region fallthrough
CT: control target
= control target key end

     0   :  { %vm22_vm0 = vcmask 1043456   ;;  %v118_v10 = vmov 839922192   ;;  %v42_v12 = vlaneseq  ;;  %v119_v35 = vmov 0   ;;  %s170_s0 = inlined_call_operand.vmem [shape: f32[2,4,256], index: 0, kind: input, shape index: {}]   ;;  %s171_s2 = inlined_call_operand.vmem [shape: f32[1,4,1], index: 2, kind: input, shape index: {}]   ;;  %s172_s1 = inlined_call_operand.vmem [shape: f32[1,4,1], index: 1, kind: input, shape index: {}]   ;;  %s173_s3 = inlined_call_operand.vmem [shape: f32[2,4,256], index: 3, kind: output, shape index: {}]  }
   0x1   :  { %v14_v0 = vld [vmem:[%s170_s0] sm:$0xff]  ;;  %v15_v1 = vld [vmem:[%s170_s0 + $0x8] sm:$0xff]  ;;  %v40_v11 = vunpack.c.l.s4 %v118_v10  ;;  %112 = vset.pattern.permute.xlu0 %v119_v35  ;;  %113 = vset.pattern.permute.xlu1 %v119_v35 }
   0x2   :  { %v18_v2 = vcombine.high %v14_v0, %v14_v0  ;;  %v23_v3 = vsel %vm22_vm0, %v14_v0, 0.0  ;;  %v19_v4 = vcombine.high %v15_v1, %v15_v1  ;;  %v28_v6 = vsel %vm22_vm0, %v15_v1, 0.0  ;;  %v89_v36 = vld [vmem:[%s171_s2] sm:$0xf] }
   0x3   :  { %v41_v14 = vunpack.c.0.s8 %v40_v11  ;;  %v43_v15 = vshrl.u32 %v42_v12, 7  ;;  %v73_v44 = vld [vmem:[%s172_s1] sm:$0xf] }
   0x4   :  { %v24_v5 = vsel %vm22_vm0, %v18_v2, 0.0  ;;  %v29_v7 = vsel %vm22_vm0, %v19_v4, 0.0 }
   0x5   :  { %v25_v8 = vadd.f32 %v24_v5, %v23_v3  ;;  %v30_v9 = vadd.f32 %v29_v7, %v28_v6  ;;  %v44_v19 = vsub.s32 %v41_v14, %v43_v15 }
   0x7   :  { %26 = vadd.xlane.f32.xlu0 %v25_v8 }
   0xb   :  { %31 = vadd.xlane.f32.xlu0 %v30_v9 }
  0x94   :  { %v27_v13 = vpop.xlane.xlu0 %26 }
  0x95   :  { %v33_v17 = vsel %vm22_vm0, %v27_v13, 0.0 }
  0x98   :  { %v32_v16 = vpop.xlane.xlu0 %31 }
  0x99   :  { %v34_v18 = vsel %vm22_vm0, %v32_v16, 0.0 }
  0x9a   :  { %v35_v20 = vadd.f32 %v34_v18, %v33_v17 }
  0x9c   :  { %v37_v21 = vmul.f32 0.001953125, %v35_v20 }
  0x9e   :  { %v45_v22 = vrot.slane %v37_v21, %v44_v19 }
  0xa0   :  { %v48_v23 = vsub.f32 %v15_v1, %v45_v22  ;;  %v47_v24 = vsub.f32 %v14_v0, %v45_v22 }
  0xa2   :  { %v49_v25 = vmul.f32 %v47_v24, %v47_v24  ;;  %v50_v26 = vmul.f32 %v48_v23, %v48_v23 }
  0xa4   :  { %v53_v27 = vcombine.high %v49_v25, %v49_v25  ;;  %v54_v28 = vcombine.high %v50_v26, %v50_v26  ;;  %v57_v29 = vsel %vm22_vm0, %v49_v25, 0.0  ;;  %v62_v33 = vsel %vm22_vm0, %v50_v26, 0.0 }
  0xa6   :  { %v58_v30 = vsel %vm22_vm0, %v53_v27, 0.0  ;;  %v63_v32 = vsel %vm22_vm0, %v54_v28, 0.0 }
  0xa7   :  { %v59_v31 = vadd.f32 %v58_v30, %v57_v29  ;;  %v64_v34 = vadd.f32 %v63_v32, %v62_v33 }
  0xa9   :  { %60 = vadd.xlane.f32.xlu1 %v59_v31 }
  0xad   :  { %65 = vadd.xlane.f32.xlu1 %v64_v34 }
  0xbe   :  { %92 = vperm.xlu1 %113, %v89_v36  }
 0x136   :  { %v61_v37 = vpop.xlane.xlu1 %60 }
 0x137   :  { %v67_v39 = vsel %vm22_vm0, %v61_v37, 0.0 }
 0x13a   :  { %v66_v38 = vpop.xlane.xlu1 %65 }
 0x13b   :  { %v68_v40 = vsel %vm22_vm0, %v66_v38, 0.0 }
 0x13c   :  { %v69_v41 = vadd.f32 %v68_v40, %v67_v39 }
 0x13e   :  { %v70_v42 = vmul.f32 0.001953125, %v69_v41  ;;  %v93_v47 = vpop.permute.xlu1 %92 }
 0x13f   :  { %v100_v50 = vrot.slane %v93_v47, %v44_v19 }
 0x140   :  { %v71_v43 = vadd.f32 1e-05, %v70_v42 }
 0x142   :  { %116 = vrsqrt.f32 %v71_v43 }
 0x14c   :  { %v117_v45 = vpop.eup %116 }
 0x14d   :  { %v74_v46 = vmul.f32 %v117_v45, %v73_v44 }
 0x14f   :  { %77 = vperm.xlu0 %112, %v74_v46  }
 0x1ce   :  { %v78_v48 = vpop.permute.xlu0 %77 }
 0x1cf   :  { %v85_v49 = vrot.slane %v78_v48, %v44_v19 }
 0x1d1   :  { %v87_v51 = vmul.f32 %v85_v49, %v47_v24  ;;  %v88_v52 = vmul.f32 %v85_v49, %v48_v23 }
 0x1d3   :  { %v102_v53 = vadd.f32 %v100_v50, %v87_v51  ;;  %v103_v54 = vadd.f32 %v100_v50, %v88_v52 }
 0x1d5   :  { %104 = vst [vmem:[%s173_s3] sm:$0xff] %v102_v53  ;;  %105 = vst [vmem:[%s173_s3 + $0x8] sm:$0xff] %v103_v54 }

</bundles_post_ra>
